<compile_context>
chip_gen: v6e
topology: v6e:2x2x1
jax: 0.10.0
libtpu: 0.0.40
codegen_flags: <defaults>
</compile_context>

<pallas_src>
import functools

import jax
import jax.numpy as jnp
from jax.experimental import pallas as pl
from jax.experimental.pallas import tpu as pltpu


# ----------------------------- Pallas kernel --------------------------------

def _mlp_l2norm_kernel(x_ref, w1_ref, b1_ref, w2_ref, b2_ref, o_ref):
    # x_ref: (tm, C)   w1_ref: (C, nc)   b1_ref: (1, nc)
    # w2_ref: (nc, nc) b2_ref: (1, nc)   o_ref: (tm, nc)  (f32)
    #
    # MXU inputs keep the caller-chosen dtype (f32 or bf16); accumulation and
    # all VPU/EUP epilogue math are f32 (required for v5e, exact everywhere).
    h = jnp.dot(x_ref[...], w1_ref[...], preferred_element_type=jnp.float32)
    h = jnp.maximum(h + b1_ref[...], 0.0)                 # Linear + ReLU (f32)
    h = h.astype(w2_ref.dtype)                            # back to MXU dtype
    y = jnp.dot(h, w2_ref[...], preferred_element_type=jnp.float32) + b2_ref[...]

    # Normalize(power=2): y / (sqrt(sum(y^2)) + 1e-7).
    # sqrt + reciprocal run on the EUP (free slot); the cross-lane sum is XLU.
    ss = jnp.sum(y * y, axis=-1, keepdims=True)
    inv = pl.reciprocal(jnp.sqrt(ss) + 1e-7, approx=True)
    o_ref[...] = (y * inv).astype(o_ref.dtype)


def _round_up(x, m):
    return ((x + m - 1) // m) * m


def _pick_tile_rows(n_rows, cap=512):
    """Pick a row-tile size.

    Big tiles amortize the ~0.35us per-grid-step pipeline overhead (measured:
    512-row tiles reach ~85% of HBM roofline), but we keep >=2 grid steps when
    possible so the row axis can shard across both TensorCores on v7x, and cap
    the tile so 2x(double-buffered x tile) stays well inside the scoped VMEM
    default on all chips (incl. v7x 64 MiB VMEM).
    """
    n8 = _round_up(max(n_rows, 1), 8)
    half = _round_up((n8 + 1) // 2, 8)   # -> at least 2 tiles when n8 > 8
    return max(8, min(cap, half))


def mlp_l2norm(x, w1, b1, w2, b2, *, mxu_dtype=None, tile_rows=None):
    """x: (N, C). Returns (N, nc) float32 = l2norm(relu(x@w1+b1)@w2+b2).

    If mxu_dtype is given (e.g. jnp.bfloat16), x/w1/w2 are cast to it at the
    pallas_call boundary (halves HBM traffic for x, native MXU dtype on
    v6e/v7x); accumulation and the norm epilogue stay f32.
    """
    n, c = x.shape
    nc = w1.shape[1]

    if mxu_dtype is not None:
        x = x.astype(mxu_dtype)
        w1 = w1.astype(mxu_dtype)
        w2 = w2.astype(mxu_dtype)
    b1 = b1.reshape(1, nc).astype(jnp.float32)
    b2 = b2.reshape(1, nc).astype(jnp.float32)

    if tile_rows is None:
        tile_rows = _pick_tile_rows(n)

    # Pad the row dim only when needed (padded rows normalize to 0, never NaN,
    # and are sliced off below).
    n_pad = _round_up(n, tile_rows)
    if n_pad != n:
        x = jnp.pad(x, ((0, n_pad - n), (0, 0)))

    grid = (n_pad // tile_rows,)

    out = pl.pallas_call(
        _mlp_l2norm_kernel,
        out_shape=jax.ShapeDtypeStruct((n_pad, nc), jnp.float32),
        grid_spec=pltpu.PrefetchScalarGridSpec(
            num_scalar_prefetch=0,
            grid=grid,
            in_specs=[
                pl.BlockSpec((tile_rows, c), lambda i: (i, 0)),   # x tile
                # Weights/biases: constant index_map -> resident, no re-DMA.
                pl.BlockSpec((c, nc), lambda i: (0, 0)),          # W1
                pl.BlockSpec((1, nc), lambda i: (0, 0)),          # b1
                pl.BlockSpec((nc, nc), lambda i: (0, 0)),         # W2
                pl.BlockSpec((1, nc), lambda i: (0, 0)),          # b2
            ],
            out_specs=pl.BlockSpec((tile_rows, nc), lambda i: (i, 0)),
        ),
        compiler_params=pltpu.CompilerParams(
            dimension_semantics=("parallel",)),
    )(x, w1, b1, w2, b2)

    return out[:n] if n_pad != n else out


# --------------------------- PatchSampleF wrapper ----------------------------

def create_mlp_params(key, feats, nc=32, init_gain=0.02):
    """Deterministic 'normal' init (std=init_gain, zero bias) per-feature MLP."""
    params = []
    for feat in feats:
        input_nc = feat.shape[1]  # NCHW -> channels
        key, k1, k2 = jax.random.split(key, 3)
        w1 = init_gain * jax.random.normal(k1, (input_nc, nc), jnp.float32)
        b1 = jnp.zeros((1, nc), jnp.float32)
        w2 = init_gain * jax.random.normal(k2, (nc, nc), jnp.float32)
        b2 = jnp.zeros((1, nc), jnp.float32)
        params.append((w1, b1, w2, b2))
    return params


@functools.partial(jax.jit, static_argnames=("mxu_dtype",))
def _sample_one_mlp(feat, patch_id, w1, b1, w2, b2, mxu_dtype=None):
    """Transpose + gather + MLP + L2-norm for one feature map, fused in one
    XLA program so the sampled rows feed the Pallas kernel without an extra
    dispatch gap."""
    B, C, H, W = feat.shape
    feat_reshape = jnp.transpose(feat, (0, 2, 3, 1)).reshape(B, H * W, C)
    x = jnp.take(feat_reshape, patch_id, axis=1).reshape(-1, C)
    return mlp_l2norm(x, w1, b1, w2, b2, mxu_dtype=mxu_dtype)


@jax.jit
def _sample_one_no_mlp(feat, patch_id):
    B, C, H, W = feat.shape
    feat_reshape = jnp.transpose(feat, (0, 2, 3, 1)).reshape(B, H * W, C)
    x = jnp.take(feat_reshape, patch_id, axis=1).reshape(-1, C)
    norm = jnp.sqrt(jnp.sum(x * x, axis=-1, keepdims=True))
    return x / (norm + 1e-7)


def patch_sample_f(feats, mlp_params=None, num_patches=64, patch_ids=None,
                   key=None, use_mlp=True, mxu_dtype=None):
    """Forward pass of PatchSampleF. feats: list of NCHW arrays.
    Returns (return_feats, return_ids)."""
    return_ids = []
    return_feats = []
    for feat_id, feat in enumerate(feats):
        B, C, H, W = feat.shape

        if num_patches > 0:
            if patch_ids is not None:
                patch_id = patch_ids[feat_id]
            else:
                key, sub = jax.random.split(key)
                perm = jax.random.permutation(sub, H * W)
                patch_id = perm[: int(min(num_patches, H * W))]
        else:
            # TODO(synk): num_patches == 0 branch (full map, reshaped back to NCHW).
            patch_id = jnp.arange(H * W, dtype=jnp.int32)

        if use_mlp:
            w1, b1, w2, b2 = mlp_params[feat_id]
            x_sample = _sample_one_mlp(feat, patch_id, w1, b1, w2, b2,
                                       mxu_dtype=mxu_dtype)
        else:
            x_sample = _sample_one_no_mlp(feat, patch_id)

        return_ids.append(patch_id)
        return_feats.append(x_sample)
    return return_feats, return_ids


# ----------------------------- reference check -------------------------------

def _reference(x, w1, b1, w2, b2):
    h = jnp.maximum(x @ w1 + b1, 0.0)
    y = h @ w2 + b2
    norm = jnp.sqrt(jnp.sum(y * y, axis=-1, keepdims=True))
    return y / (norm + 1e-7)


def _gather_ref_input(feat, patch_id):
    B, C, H, W = feat.shape
    fr = jnp.transpose(feat, (0, 2, 3, 1)).reshape(B, H * W, C)
    return fr[:, patch_id, :].reshape(-1, C)


if __name__ == "__main__":
    key = jax.random.PRNGKey(0)
    k_feat0, k_feat1, k_mlp, k_perm = jax.random.split(key, 4)

    # Two small feature maps (NCHW), like two intermediate layers of a generator.
    feats = [
        jax.random.normal(k_feat0, (2, 4, 16, 16), jnp.float32),   # B=2, C=4, 16x16
        jax.random.normal(k_feat1, (2, 8, 8, 8), jnp.float32),     # B=2, C=8, 8x8
    ]
    nc = 32
    num_patches = 64   # 2 * 64 = 128 sampled rows per feature -> 2 row tiles

    mlp_params = create_mlp_params(k_mlp, feats, nc=nc, init_gain=0.02)

    ok = True

    # --- f32 MXU path (exact parity with the PyTorch module) ---
    out_feats, out_ids = patch_sample_f(
        feats, mlp_params, num_patches=num_patches, patch_ids=None, key=k_perm)
    out_feats = [jax.block_until_ready(f) for f in out_feats]

    for feat_id, feat in enumerate(feats):
        B, C, H, W = feat.shape
        x = _gather_ref_input(feat, out_ids[feat_id])
        ref = _reference(x, *mlp_params[feat_id])
        got = out_feats[feat_id]
        n_expect = B * int(min(num_patches, H * W))
        if got.shape != (n_expect, nc):
            ok = False
        # small tolerance for the EUP approximate reciprocal in the L2 norm
        if not jnp.allclose(got, ref, atol=5e-3, rtol=5e-3):
            ok = False

    # --- bf16 MXU path (recommended on v6e/v7x), reusing the same patch ids ---
    out_bf16, _ = patch_sample_f(
        feats, mlp_params, num_patches=num_patches, patch_ids=out_ids,
        mxu_dtype=jnp.bfloat16)
    out_bf16 = [jax.block_until_ready(f) for f in out_bf16]

    for feat_id, feat in enumerate(feats):
        x = _gather_ref_input(feat, out_ids[feat_id])
        ref = _reference(x, *mlp_params[feat_id])
        if not jnp.allclose(out_bf16[feat_id], ref, atol=3e-2, rtol=3e-2):
            ok = False

    print("KERNEL_OK" if ok else "KERNEL_MISMATCH")
</pallas_src>

<mosaic_0001>
module attributes {stable_mosaic.version = 11 : i64} {
  func.func @_mlp_l2norm_kernel(%arg0: i32, %arg1: memref<64x4xf32, #tpu.memory_space<vmem>>, %arg2: memref<4x32xf32, #tpu.memory_space<vmem>>, %arg3: memref<1x32xf32, #tpu.memory_space<vmem>>, %arg4: memref<32x32xf32, #tpu.memory_space<vmem>>, %arg5: memref<1x32xf32, #tpu.memory_space<vmem>>, %arg6: memref<64x32xf32, #tpu.memory_space<vmem>>) attributes {dimension_semantics = [#tpu.dimension_semantics<parallel>], iteration_bounds = array<i64: 2>, scalar_prefetch = 0 : i64, scratch_operands = 0 : i64, tpu.core_type = #tpu.core_type<tc>, window_params = [{transform_indices = @transform_0, window_bounds = array<i64: 64, 4>}, {pipeline_mode = #tpu.pipeline_mode<synchronous>, transform_indices = @transform_1, window_bounds = array<i64: 4, 32>}, {pipeline_mode = #tpu.pipeline_mode<synchronous>, transform_indices = @transform_2, window_bounds = array<i64: 1, 32>}, {pipeline_mode = #tpu.pipeline_mode<synchronous>, transform_indices = @transform_3, window_bounds = array<i64: 32, 32>}, {pipeline_mode = #tpu.pipeline_mode<synchronous>, transform_indices = @transform_4, window_bounds = array<i64: 1, 32>}, {transform_indices = @transform_5, window_bounds = array<i64: 64, 32>}]} {
    %c0 = arith.constant 0 : index
    %c0_0 = arith.constant 0 : index
    %0 = vector.load %arg1[%c0, %c0_0] : memref<64x4xf32, #tpu.memory_space<vmem>>, vector<64x4xf32>
    %c0_1 = arith.constant 0 : index
    %c0_2 = arith.constant 0 : index
    %1 = vector.load %arg2[%c0_1, %c0_2] : memref<4x32xf32, #tpu.memory_space<vmem>>, vector<4x32xf32>
    %cst = arith.constant dense<0.000000e+00> : vector<64x32xf32>
    %2 = tpu.matmul %0, %1, %cst {dimension_numbers = #tpu.dot_dimension_numbers<[1], [0], [0], [1], [0, 0, 1, 1], [], []>} : vector<64x4xf32>, vector<4x32xf32>, vector<64x32xf32> -> vector<64x32xf32>
    %c0_3 = arith.constant 0 : index
    %c0_4 = arith.constant 0 : index
    %3 = vector.load %arg3[%c0_3, %c0_4] : memref<1x32xf32, #tpu.memory_space<vmem>>, vector<1x32xf32>
    %4 = vector.broadcast %3 : vector<1x32xf32> to vector<64x32xf32>
    %5 = arith.addf %2, %4 : vector<64x32xf32>
    %cst_5 = arith.constant 0.000000e+00 : f32
    %6 = vector.broadcast %cst_5 : f32 to vector<64x32xf32>
    %7 = arith.maximumf %5, %6 : vector<64x32xf32>
    %c0_6 = arith.constant 0 : index
    %c0_7 = arith.constant 0 : index
    %8 = vector.load %arg4[%c0_6, %c0_7] : memref<32x32xf32, #tpu.memory_space<vmem>>, vector<32x32xf32>
    %cst_8 = arith.constant dense<0.000000e+00> : vector<64x32xf32>
    %9 = tpu.matmul %7, %8, %cst_8 {dimension_numbers = #tpu.dot_dimension_numbers<[1], [0], [0], [1], [0, 0, 1, 1], [], []>} : vector<64x32xf32>, vector<32x32xf32>, vector<64x32xf32> -> vector<64x32xf32>
    %c0_9 = arith.constant 0 : index
    %c0_10 = arith.constant 0 : index
    %10 = vector.load %arg5[%c0_9, %c0_10] : memref<1x32xf32, #tpu.memory_space<vmem>>, vector<1x32xf32>
    %11 = vector.broadcast %10 : vector<1x32xf32> to vector<64x32xf32>
    %12 = arith.addf %9, %11 : vector<64x32xf32>
    %13 = arith.mulf %12, %12 : vector<64x32xf32>
    %cst_11 = arith.constant dense<0.000000e+00> : vector<64xf32>
    %14 = vector.multi_reduction <add>, %13, %cst_11 [1] : vector<64x32xf32> to vector<64xf32>
    %15 = vector.shape_cast %14 : vector<64xf32> to vector<64x1xf32>
    %16 = math.sqrt %15 : vector<64x1xf32>
    %cst_12 = arith.constant 1.000000e-07 : f32
    %17 = vector.broadcast %cst_12 : f32 to vector<64x1xf32>
    %18 = arith.addf %16, %17 : vector<64x1xf32>
    %19 = tpu.reciprocal %18 {approx = true} : vector<64x1xf32> -> vector<64x1xf32>
    %20 = vector.broadcast %19 : vector<64x1xf32> to vector<64x32xf32>
    %21 = arith.mulf %12, %20 : vector<64x32xf32>
    %c0_13 = arith.constant 0 : index
    %c0_14 = arith.constant 0 : index
    %22 = vector.load %arg6[%c0_13, %c0_14] : memref<64x32xf32, #tpu.memory_space<vmem>>, vector<64x32xf32>
    tpu.vector_store %arg6[%c0_13, %c0_14], %21 {strides = array<i32>} : memref<64x32xf32, #tpu.memory_space<vmem>>, vector<64x32xf32>,
    return
  }
  func.func @transform_0(%arg0: i32) -> (i32, i32) {
    %c0_i32 = arith.constant 0 : i32
    %c0_i32_0 = arith.constant 0 : i32
    return %arg0, %c0_i32 : i32, i32
  }
  func.func @transform_1(%arg0: i32) -> (i32, i32) {
    %c0_i32 = arith.constant 0 : i32
    %c0_i32_0 = arith.constant 0 : i32
    %c0_i32_1 = arith.constant 0 : i32
    return %c0_i32, %c0_i32_0 : i32, i32
  }
  func.func @transform_2(%arg0: i32) -> (i32, i32) {
    %c0_i32 = arith.constant 0 : i32
    %c0_i32_0 = arith.constant 0 : i32
    %c0_i32_1 = arith.constant 0 : i32
    return %c0_i32, %c0_i32_0 : i32, i32
  }
  func.func @transform_3(%arg0: i32) -> (i32, i32) {
    %c0_i32 = arith.constant 0 : i32
    %c0_i32_0 = arith.constant 0 : i32
    %c0_i32_1 = arith.constant 0 : i32
    return %c0_i32, %c0_i32_0 : i32, i32
  }
  func.func @transform_4(%arg0: i32) -> (i32, i32) {
    %c0_i32 = arith.constant 0 : i32
    %c0_i32_0 = arith.constant 0 : i32
    %c0_i32_1 = arith.constant 0 : i32
    return %c0_i32, %c0_i32_0 : i32, i32
  }
  func.func @transform_5(%arg0: i32) -> (i32, i32) {
    %c0_i32 = arith.constant 0 : i32
    %c0_i32_0 = arith.constant 0 : i32
    return %arg0, %c0_i32 : i32, i32
  }
}

</mosaic_0001>

<bundles_post_ra>
// kernel: _sample_one_mlp.1
= control target key start
LH: loop header
LB: loop body
LE: loop exit
PB: predicated region body
PF: predicated region fallthrough
CT: control target
= control target key end

     0   :  { %s866_s18 = smov 0   ;;  %s999_s0 = inlined_call_operand.vmem [shape: f32[128,4], index: 0, kind: input, shape index: {}]   ;;  %s1000_s1 = inlined_call_operand.vmem [shape: f32[4,32], index: 1, kind: input, shape index: {}]   ;;  %s1001_s2 = inlined_call_operand.vmem [shape: f32[1,32], index: 2, kind: input, shape index: {}]   ;;  %s1002_s3 = inlined_call_operand.vmem [shape: f32[32,32], index: 3, kind: input, shape index: {}]   ;;  %s1003_s4 = inlined_call_operand.vmem [shape: f32[1,32], index: 4, kind: input, shape index: {}]   ;;  %s1004_s5 = inlined_call_operand.vmem [shape: f32[128,32], index: 5, kind: output, shape index: {}]  }
   0x1 LB: > { %s703_s19 = sadd.s32 4294967295, %s834_s18   ;;  %p707_p0 = scmp.ge.s32.totalorder %s834_s18, 1  ;;  %s834_s18 = sphi %s866_s18, %s15_s18  }
   0x2   : > { %p188_p1 = scmp.lt.s32.totalorder %s834_s18, 3 }
   0x4   : > { %p189_p2 = pnand %p707_p0, %p188_p1 }
   0x5   : > { %s708_s22 = sshll.u32 (!%p189_p2), %s703_s19, 3 }
   0x6   : > { %192 = sbr.rel (%p189_p2) target bundleno = 605 (0x25d), region = 40  ;;  %p217_p3 = scmp.lt.s32.totalorder (!%p189_p2), %s708_s22, 15 }
   0xb   : > { %v236_v0 = vld [vmem:[%s1000_s1] sm:$0xf]  ;;  %vm269_vm0 = vcmask 1043456   ;;  %s1006_s22 = smov (!%p217_p3, %s708_s22), 15  ;;  %vm244_vm1 = vcmask 31744   ;;  %v389_v9 = vld [vmem:[%s1002_s3 + $0x18] sm:$0xff] }
   0xc   : > { %754 = vmatprep.subr.msk.mxu0 %vm269_vm0, %v236_v0  ;;  %s709_s23 = sshll.u32 %s1006_s22, 3  ;;  %768 = vmatprep.subr.mxu1 %v389_v9  ;;  %v388_v10 = vld [vmem:[%s1002_s3 + $0x10] sm:$0xff]  ;;  %v387_v11 = vld [vmem:[%s1002_s3 + $0x8] sm:$0xff]  ;;  %v386_v12 = vld [vmem:[%s1002_s3] sm:$0xff]  ;;  %vm397_vm2 = vcmask 261120  }
   0xd   : > { %755 = vmatpush3.msk.msra.mxu0 %vm269_vm0, %v236_v0  ;;  %s220_s26 = scalar_lea.vmem %s999_s0, %s709_s23  ;;  %769 = vmatpush3.msra.mxu1 %v389_v9  ;;  %v712_v13 = vld [vmem:[%s1001_s2] ss:$0 sm:$0xff]  ;;  %s226_s16 = scalar_lea.vmem %s1004_s5, %s709_s23 }
   0xe   : > { %v228_v1 = vld [vmem:[%s220_s26] sm:$0xff]  ;;  %v229_v2 = vld [vmem:[%s220_s26 + $0x8] sm:$0xff]  ;;  %v230_v3 = vld [vmem:[%s220_s26 + $0x10] sm:$0xff]  ;;  %770 = vmatprep.subr.mxu1 %v388_v10 }
   0xf   : > { %756 = vmatprep.mubr.msk.f32.mxu0 %vm244_vm1, %v228_v1  ;;  %v231_v4 = vld [vmem:[%s220_s26 + $0x18] sm:$0xff]  ;;  %v232_v5 = vld [vmem:[%s220_s26 + $0x20] sm:$0xff]  ;;  %v233_v6 = vld [vmem:[%s220_s26 + $0x28] sm:$0xff]  ;;  %771 = vmatpush3.msra.mxu1 %v388_v10 }
  0x10   : > { %757 = vmatmul.mubr.msk.f32.vlgmr.msra.gmra.mxu0 %vm244_vm1, %v229_v2  ;;  %v234_v7 = vld [vmem:[%s220_s26 + $0x30] sm:$0xff]  ;;  %v235_v8 = vld [vmem:[%s220_s26 + $0x38] sm:$0xff]  ;;  %772 = vmatprep.subr.mxu1 %v387_v11  ;;  %v722_v38 = vld [vmem:[%s1003_s4] ss:$0 sm:$0xff] }
  0x11   : > { %759 = vmatprep.mubr.msk.f32.mxu0 %vm244_vm1, %v230_v3  ;;  %773 = vmatpush3.msra.mxu1 %v387_v11 }
  0x12   : > { %774 = vmatprep.subr.mxu1 %v386_v12 }
  0x13   : > { %775 = vmatpush3.msra.mxu1 %v386_v12 }
  0x14   : > { %760 = vmatmul.mubr.msk.f32.gmra.mxu0 %vm244_vm1, %v231_v4 }
  0x15   : > { %762 = vmatprep.mubr.msk.f32.mxu0 %vm244_vm1, %v232_v5 }
  0x18   : > { %763 = vmatmul.mubr.msk.f32.gmra.mxu0 %vm244_vm1, %v233_v6 }
  0x19   : > { %765 = vmatprep.mubr.msk.f32.mxu0 %vm244_vm1, %v234_v7 }
  0x1c   : > { %766 = vmatmul.mubr.msk.f32.gmra.mxu0 %vm244_vm1, %v235_v8 }
  0xd0   : > { %v758_v14 = vpop.f32.mrf.mxu0 }
  0xd1   : > { %v345_v15 = vadd.f32 %v758_v14, %v712_v13 }
  0xd2   : > { %v339_v16 = vpop.f32.mrf.mxu0 }
  0xd3   : > { %v340_v17 = vadd.f32 %v712_v13, %v339_v16  ;;  %v379_v20 = vmax.f32 %v345_v15, 0.0 }
  0xd4   : > { %v761_v18 = vpop.f32.mrf.mxu0 }
  0xd5   : > { %v378_v19 = vmax.f32 %v340_v17, 0.0  ;;  %v355_v21 = vadd.f32 %v761_v18, %v712_v13 }
  0xd6   : > { %v349_v22 = vpop.f32.mrf.mxu0 }
  0xd7   : > { %v350_v23 = vadd.f32 %v712_v13, %v349_v22  ;;  %776 = vmatprep.mubr.msk.f32.mxu1 %vm397_vm2, %v378_v19  ;;  %v381_v27 = vmax.f32 %v355_v21, 0.0 }
  0xd8   : > { %v764_v24 = vpop.f32.mrf.mxu0  ;;  %777 = vmatmul.mubr.msk.f32.vlgmr.msra.gmra.mxu1 %vm397_vm2, %v379_v20 }
  0xd9   : > { %v380_v25 = vmax.f32 %v350_v23, 0.0  ;;  %v365_v26 = vadd.f32 %v764_v24, %v712_v13 }
  0xda   : > { %v359_v28 = vpop.f32.mrf.mxu0 }
  0xdb   : > { %v360_v29 = vadd.f32 %v712_v13, %v359_v28  ;;  %779 = vmatprep.mubr.msk.f32.mxu1 %vm397_vm2, %v380_v25  ;;  %v383_v30 = vmax.f32 %v365_v26, 0.0 }
  0xdc   : > { %v767_v31 = vpop.f32.mrf.mxu0  ;;  %780 = vmatmul.mubr.msk.f32.gmra.mxu1 %vm397_vm2, %v381_v27 }
  0xdd   : > { %v382_v32 = vmax.f32 %v360_v29, 0.0  ;;  %v375_v33 = vadd.f32 %v767_v31, %v712_v13 }
  0xde   : > { %v369_v34 = vpop.f32.mrf.mxu0 }
  0xdf   : > { %v370_v35 = vadd.f32 %v712_v13, %v369_v34  ;;  %782 = vmatprep.mubr.msk.f32.mxu1 %vm397_vm2, %v382_v32  ;;  %v385_v36 = vmax.f32 %v375_v33, 0.0 }
  0xe0   : > { %783 = vmatmul.mubr.msk.f32.gmra.mxu1 %vm397_vm2, %v383_v30 }
  0xe1   : > { %v384_v37 = vmax.f32 %v370_v35, 0.0 }
  0xe3   : > { %785 = vmatprep.mubr.msk.f32.mxu1 %vm397_vm2, %v384_v37 }
  0xe4   : > { %786 = vmatmul.mubr.msk.f32.gmra.mxu1 %vm397_vm2, %v385_v36 }
 0x198   : > { %v778_v39 = vpop.f32.mrf.mxu1 }
 0x199   : > { %v919_v40 = vadd.f32 %v778_v39, %v722_v38 }
 0x19a   : > { %v488_v41 = vpop.f32.mrf.mxu1 }
 0x19b   : > { %v921_v42 = vadd.f32 %v722_v38, %v488_v41  ;;  %v528_v43 = vmul.f32 %v919_v40, %v919_v40 }
 0x19c   : > { %v781_v44 = vpop.f32.mrf.mxu1 }
 0x19d   : > { %v925_v45 = vadd.f32 %v781_v44, %v722_v38  ;;  %v538_v46 = vsel %vm397_vm2, %v528_v43, 0.0  ;;  %v527_v47 = vmul.f32 %v921_v42, %v921_v42 }
 0x19e   : > { %539 = vadd.xlane.f32.xlu0 %v538_v46  ;;  %v498_v48 = vpop.f32.mrf.mxu1 }
 0x19f   : > { %v930_v49 = vadd.f32 %v722_v38, %v498_v48  ;;  %v530_v50 = vmul.f32 %v925_v45, %v925_v45  ;;  %v535_v54 = vsel %vm397_vm2, %v527_v47, 0.0 }
 0x1a0   : > { %v784_v51 = vpop.f32.mrf.mxu1 }
 0x1a1   : > { %v934_v52 = vadd.f32 %v784_v51, %v722_v38  ;;  %v544_v53 = vsel %vm397_vm2, %v530_v50, 0.0  ;;  %v529_v55 = vmul.f32 %v930_v49, %v930_v49 }
 0x1a2   : > { %545 = vadd.xlane.f32.xlu1 %v544_v53  ;;  %v508_v56 = vpop.f32.mrf.mxu1  ;;  %536 = vadd.xlane.f32.xlu0 %v535_v54 }
 0x1a3   : > { %v940_v57 = vadd.f32 %v722_v38, %v508_v56  ;;  %v541_v60 = vsel %vm397_vm2, %v529_v55, 0.0  ;;  %v532_v62 = vmul.f32 %v934_v52, %v934_v52 }
 0x1a4   : > { %v787_v58 = vpop.f32.mrf.mxu1 }
 0x1a5   : > { %v942_v59 = vadd.f32 %v787_v58, %v722_v38  ;;  %v531_v61 = vmul.f32 %v940_v57, %v940_v57  ;;  %v550_v2 = vsel %vm397_vm2, %v532_v62, 0.0 }
 0x1a6   : > { %v518_v63 = vpop.f32.mrf.mxu1  ;;  %542 = vadd.xlane.f32.xlu1 %v541_v60 }
 0x1a7   : > { %v949_v0 = vadd.f32 %v722_v38, %v518_v63  ;;  %v547_v1 = vsel %vm397_vm2, %v531_v61, 0.0  ;;  %v534_v4 = vmul.f32 %v942_v59, %v942_v59 }
 0x1a8   : > { %548 = vadd.xlane.f32.xlu0 %v547_v1 }
 0x1a9   : > { %v533_v3 = vmul.f32 %v949_v0, %v949_v0  ;;  %v556_v6 = vsel %vm397_vm2, %v534_v4, 0.0 }
 0x1aa   : > { %551 = vadd.xlane.f32.xlu1 %v550_v2 }
 0x1ab   : > { %v553_v5 = vsel %vm397_vm2, %v533_v3, 0.0 }
 0x1ac   : > { %554 = vadd.xlane.f32.xlu0 %v553_v5 }
 0x1ae   : > { %557 = vadd.xlane.f32.xlu1 %v556_v6 }
 0x227   : > { %v540_v7 = vpop.xlane.xlu0 %539 }
 0x228   : > { %796 = vrsqrt.f32 %v540_v7  ;;  %vm568_vm3 = vcmp.eq.f32.partialorder %v540_v7, inf  ;;  %v571_v16 = vand.u32 2147483648, %v540_v7  ;;  %vm570_vm4 = vcmp.eq.f32.partialorder %v540_v7, 0.0 }
 0x22b   : > { %v546_v8 = vpop.xlane.xlu1 %545  ;;  %v537_v9 = vpop.xlane.xlu0 %536 }
 0x22c   : > { %798 = vrsqrt.f32 %v546_v8  ;;  %vm582_vm5 = vcmp.eq.f32.partialorder %v546_v8, inf  ;;  %vm584_vm6 = vcmp.eq.f32.partialorder %v546_v8, 0.0  ;;  %v585_v24 = vand.u32 2147483648, %v546_v8 }
 0x22d   : > { %800 = vrsqrt.f32 %v537_v9  ;;  %vm561_vm7 = vcmp.eq.f32.partialorder %v537_v9, inf  ;;  %v564_v27 = vand.u32 2147483648, %v537_v9  ;;  %vm563_vm8 = vcmp.eq.f32.partialorder %v537_v9, 0.0 }
 0x22f   : > { %v543_v10 = vpop.xlane.xlu1 %542 }
 0x230   : > { %802 = vrsqrt.f32 %v543_v10  ;;  %vm575_vm9 = vcmp.eq.f32.partialorder %v543_v10, inf  ;;  %v578_v36 = vand.u32 2147483648, %v543_v10  ;;  %vm577_vm10 = vcmp.eq.f32.partialorder %v543_v10, 0.0 }
 0x231   : > { %v549_v11 = vpop.xlane.xlu0 %548 }
 0x232   : > { %804 = vrsqrt.f32 %v549_v11  ;;  %vm589_vm11 = vcmp.eq.f32.partialorder %v549_v11, inf  ;;  %v592_v43 = vand.u32 2147483648, %v549_v11  ;;  %vm591_vm12 = vcmp.eq.f32.partialorder %v549_v11, 0.0 }
 0x233   : > { %v552_v12 = vpop.xlane.xlu1 %551 }
 0x234   : > { %806 = vrsqrt.f32 %v552_v12  ;;  %vm596_vm13 = vcmp.eq.f32.partialorder %v552_v12, inf  ;;  %vm598_vm14 = vcmp.eq.f32.partialorder %v552_v12, 0.0  ;;  %v599_v51 = vand.u32 2147483648, %v552_v12 }
 0x235   : > { %v797_v13 = vpop.eup %796  ;;  %v959_v14 = vpop.xlane.xlu0 %554 }
 0x236   : > { %v567_v15 = vmul.f32 %v797_v13, %v540_v7  ;;  %808 = vrsqrt.f32 %v959_v14  ;;  %vm603_vm15 = vcmp.eq.f32.partialorder %v959_v14, inf  ;;  %vm605_vm0 = vcmp.eq.f32.partialorder %v959_v14, 0.0 }
 0x237   : > { %v962_v17 = vpop.xlane.xlu1 %557  ;;  %v606_v60 = vand.u32 2147483648, %v959_v14 }
 0x238   : > { %v569_v18 = vsel %vm568_vm3, %v540_v7, %v567_v15  ;;  %810 = vrsqrt.f32 %v962_v17  ;;  %vm610_vm1 = vcmp.eq.f32.partialorder %v962_v17, inf  ;;  %v613_v2 = vand.u32 2147483648, %v962_v17 }
 0x239   : > { %v799_v19 = vpop.eup %798  ;;  %v572_v20 = vsel %vm570_vm4, %v571_v16, %v569_v18  ;;  %vm612_vm3 = vcmp.eq.f32.partialorder %v962_v17, 0.0 }
 0x23a   : > { %v801_v21 = vpop.eup %800  ;;  %v616_v22 = vadd.f32 1e-07, %v572_v20  ;;  %v581_v23 = vmul.f32 %v799_v19, %v546_v8 }
 0x23b   : > { %v560_v25 = vmul.f32 %v801_v21, %v537_v9 }
 0x23c   : > { %812 = vrcp.f32 %v616_v22  ;;  %v583_v26 = vsel %vm582_vm5, %v546_v8, %v581_v23 }
 0x23d   : > { %v803_v28 = vpop.eup %802  ;;  %v586_v29 = vsel %vm584_vm6, %v585_v24, %v583_v26  ;;  %v562_v30 = vsel %vm561_vm7, %v537_v9, %v560_v25 }
 0x23e   : > { %v618_v31 = vadd.f32 1e-07, %v586_v29  ;;  %v565_v32 = vsel %vm563_vm8, %v564_v27, %v562_v30  ;;  %v574_v33 = vmul.f32 %v803_v28, %v543_v10 }
 0x23f   : > { %v805_v34 = vpop.eup %804  ;;  %v615_v35 = vadd.f32 1e-07, %v565_v32 }
 0x240   : > { %814 = vrcp.f32 %v618_v31  ;;  %v576_v37 = vsel %vm575_vm9, %v543_v10, %v574_v33  ;;  %v588_v38 = vmul.f32 %v805_v34, %v549_v11 }
 0x241   : > { %v807_v39 = vpop.eup %806  ;;  %816 = vrcp.f32 %v615_v35  ;;  %v579_v41 = vsel %vm577_vm10, %v578_v36, %v576_v37 }
 0x242   : > { %v617_v44 = vadd.f32 1e-07, %v579_v41  ;;  %v590_v46 = vsel %vm589_vm11, %v549_v11, %v588_v38  ;;  %v595_v47 = vmul.f32 %v807_v39, %v552_v12 }
 0x243   : > { %v809_v48 = vpop.eup %808  ;;  %v593_v50 = vsel %vm591_vm12, %v592_v43, %v590_v46 }
 0x244   : > { %818 = vrcp.f32 %v617_v44  ;;  %v619_v53 = vadd.f32 1e-07, %v593_v50  ;;  %v597_v54 = vsel %vm596_vm13, %v552_v12, %v595_v47  ;;  %v602_v55 = vmul.f32 %v809_v48, %v959_v14 }
 0x245   : > { %v811_v56 = vpop.eup %810  ;;  %v600_v58 = vsel %vm598_vm14, %v599_v51, %v597_v54 }
 0x246   : > { %820 = vrcp.f32 %v619_v53  ;;  %v620_v61 = vadd.f32 1e-07, %v600_v58  ;;  %v604_v62 = vsel %vm603_vm15, %v959_v14, %v602_v55  ;;  %v609_v63 = vmul.f32 %v811_v56, %v962_v17 }
 0x247   : > { %v607_v1 = vsel %vm605_vm0, %v606_v60, %v604_v62 }
 0x248   : > { %822 = vrcp.f32 %v620_v61  ;;  %v621_v3 = vadd.f32 1e-07, %v607_v1  ;;  %v611_v4 = vsel %vm610_vm1, %v962_v17, %v609_v63 }
 0x249   : > { %v813_v5 = vpop.eup %812  ;;  %v614_v6 = vsel %vm612_vm3, %v613_v2, %v611_v4 }
 0x24a   : > { %v632_v7 = vmul.f32 %v813_v5, %v919_v40  ;;  %824 = vrcp.f32 %v621_v3  ;;  %v622_v8 = vadd.f32 1e-07, %v614_v6 }
 0x24c   : > { %640 = vst.msk [vmem:[%s226_s16 + $0x8] sm:$0xff] %vm397_vm2, %v632_v7  ;;  %826 = vrcp.f32 %v622_v8 }
 0x24d   : > { %v815_v9 = vpop.eup %814 }
 0x24e   : > { %v817_v10 = vpop.eup %816  ;;  %v634_v11 = vmul.f32 %v815_v9, %v925_v45 }
 0x24f   : > { %v631_v12 = vmul.f32 %v817_v10, %v921_v42 }
 0x250   : > { %642 = vst.msk [vmem:[%s226_s16 + $0x18] sm:$0xff] %vm397_vm2, %v634_v11 }
 0x251   : > { %v819_v13 = vpop.eup %818  ;;  %639 = vst.msk [vmem:[%s226_s16] sm:$0xff] %vm397_vm2, %v631_v12 }
 0x252   : > { %v633_v14 = vmul.f32 %v819_v13, %v930_v49 }
 0x253   : > { %v821_v15 = vpop.eup %820 }
 0x254   : > { %641 = vst.msk [vmem:[%s226_s16 + $0x10] sm:$0xff] %vm397_vm2, %v633_v14  ;;  %v635_v40 = vmul.f32 %v821_v15, %v940_v57 }
 0x255   : > { %v823_v16 = vpop.eup %822 }
 0x256   : > { %643 = vst.msk [vmem:[%s226_s16 + $0x20] sm:$0xff] %vm397_vm2, %v635_v40  ;;  %v636_v17 = vmul.f32 %v823_v16, %v934_v52 }
 0x257   : > { %v825_v45 = vpop.eup %824 }
 0x258   : > { %644 = vst.msk [vmem:[%s226_s16 + $0x28] sm:$0xff] %vm397_vm2, %v636_v17  ;;  %v637_v42 = vmul.f32 %v825_v45, %v949_v0 }
 0x259   : > { %v827_v18 = vpop.eup %826 }
 0x25a   : > { %645 = vst.msk [vmem:[%s226_s16 + $0x30] sm:$0xff] %vm397_vm2, %v637_v42  ;;  %v638_v49 = vmul.f32 %v827_v18, %v942_v59 }
 0x25c   : > { %646 = vst.msk [vmem:[%s226_s16 + $0x38] sm:$0xff] %vm397_vm2, %v638_v49 }
 0x25d PF: > { %s15_s18 = sadd.s32 1, %s834_s18  }
 0x25e   : > { %p12_p4 = scmp.ge.s32.totalorder %s15_s18, 4  }
 0x260   :  { %14 = sbr.rel (!%p12_p4) target bundleno = 1 (0x1), region = 70 }

</bundles_post_ra>
